<compile_context>
chip_gen: v7x
topology: tpu7x:2x2x1
jax: 0.10.0
libtpu: 0.0.40
codegen_flags: <defaults>
</compile_context>

<pallas_src>
import functools

import jax
import jax.numpy as jnp
from jax.experimental import pallas as pl
from jax.experimental.pallas import tpu as pltpu


def _reduce_over_k(v, K, C, op):
    """Reduce over the K neighbours of each channel, lane-dense.

    v: (tm, K*C) with lane index k*C + c.  The K-group of a lane (all lanes
    sharing channel c, stride C) is closed under circular rolls by multiples
    of C, so a log2(K) butterfly (power-of-two K) or a K-1 roll chain gives
    the per-group reduction broadcast back to every member.  All rolls ride
    the XLU slot (free w.r.t. the VPU/MXU slots).
    """
    L = K * C
    if K & (K - 1) == 0:                    # power-of-two K: butterfly
        sh = C
        while sh < L:
            v = op(v, pltpu.roll(v, shift=sh, axis=1))
            sh *= 2
        return v
    acc, r = v, v                           # general K: K-1 roll chain
    for _ in range(K - 1):
        r = pltpu.roll(r, shift=C, axis=1)
        acc = op(acc, r)
    return acc


def att_pooling_kernel(x_ref, wfc_ref, wmlp_ref, shift_ref, o_ref, *, K, C_in):
    x = x_ref[...].astype(jnp.float32)              # (tm, K*C_in), lane-dense
    # Matmul inputs follow the weight dtype (f32 for small L; bf16 once the fc
    # matmul is big enough to be MXU-bound on v6e/v7x).  Accumulation is f32.
    xm = x.astype(wfc_ref.dtype)

    GC = wfc_ref.shape[0]                           # group lanes = G * C_in
    G = GC // C_in
    wfc = wfc_ref[...]
    if G == K:
        # single block-diagonal matmul (optimal when L = K*C_in <= ~256)
        att = jnp.dot(xm, wfc, preferred_element_type=jnp.float32)
    else:
        # grouped block-diagonal fc: K/G matmuls against one (GC, GC) block,
        # capping the K^2*C_in^2 FLOP blow-up of a dense (L, L) weight.
        parts = [
            jnp.dot(xm[:, g * GC:(g + 1) * GC], wfc,
                    preferred_element_type=jnp.float32)
            for g in range(K // G)
        ]
        att = jnp.concatenate(parts, axis=1)

    # softmax over K (stride-C_in lane groups); reductions ride the XLU slot.
    m = _reduce_over_k(att, K, C_in, jnp.maximum)
    e = jnp.exp(att - m)                            # EUP
    s = _reduce_over_k(e, K, C_in, jnp.add)
    r = pl.reciprocal(s, approx=True)               # EUP slot
    r = r * (2.0 - s * r)                           # one Newton step -> ~exact
    y = x * (e * r)                                 # feature * att_score

    # fused [sum over K] + mlp 1x1 conv (tiled W_mlp^T with BN scale folded
    # in), then BN shift + ReLU.
    ym = y.astype(wmlp_ref.dtype)
    out = jnp.dot(ym, wmlp_ref[...], preferred_element_type=jnp.float32)
    out = out + shift_ref[...]
    # TODO(synk): C_out < 128 lowers to masked vst partial stores; the kernel
    # is HBM-bound at these shapes so padding the output to 128 lanes would
    # only multiply writeback traffic — leave lane-narrow unless a bundle dump
    # shows the store slot binding.
    o_ref[...] = jnp.maximum(out, 0.0).astype(o_ref.dtype)


def _choose_tm(M, L, C_out, x_bytes, out_bytes, w_vmem_bytes,
               vmem_request=32 << 20):
    """Row-tile size: weight-aware, divisor-of-M / even-tile-count preferring.

    Weight blocks are single-buffered (pl.Buffered(1)); x / out blocks are
    double-buffered; ~8 lane-dense f32 temporaries live in the kernel body.
    """
    per_row = 2 * L * x_bytes + 2 * C_out * out_bytes + 8 * L * 4
    budget = max(vmem_request - w_vmem_bytes - (4 << 20),  # compiler headroom
                 per_row * 8)
    # Cap at 1024 rows: near the HBM roofline already on v5e/v6e; do NOT raise
    # for v7x (64 MiB physical / 32 MiB scoped VMEM).
    tm = max(8, min(1024, budget // per_row, M))
    # Prefer >= 4 grid steps so the "parallel" axis balances across v7x's two
    # TensorCores (even split) while keeping the pipeline fed.
    if M >= 32:
        tm = min(tm, M // 4)
    tm = max(8, (tm // 8) * 8)
    # Within ~25% of the VMEM-optimal size, prefer a tm that divides M exactly
    # (skips the jnp.pad HBM copy) and yields an even tile count.
    best_key, best_tm = None, tm
    lo = max(8, (int(tm * 0.75) // 8) * 8)
    for cand in range(tm, lo - 1, -8):
        nt = -(-M // cand)
        key = (M % cand == 0, nt % 2 == 0 or nt == 1, cand)
        if best_key is None or key > best_key:
            best_key, best_tm = key, cand
    return best_tm


def prepare_att_pooling_params(w_fc, w_mlp, gamma, beta, run_mean, run_var, K,
                               eps=1e-5, matmul_dtype=None,
                               group_lane_target=256):
    """Pre-compute kernel-side weights ONCE per layer (hoisted out of forward).

    Returns (wfc_g, wmlp_bn, shift):
      wfc_g   : (G*C_in, G*C_in) block-diagonal fc weight (G neighbours/group)
      wmlp_bn : (K*C_in, C_out)  W_mlp^T tiled K times with BN scale folded in
      shift   : (1, C_out)       folded eval-mode BN shift (single bias input)
    """
    C_in = w_fc.shape[0]
    C_out = w_mlp.shape[0]
    L = K * C_in
    if matmul_dtype is None:
        # bf16 matmul inputs only pay off once the fc matmul is MXU-bound
        # (v6e/v7x, large L); small L stays f32 to hold ~1e-4 accuracy.
        matmul_dtype = jnp.float32 if L < 512 else jnp.bfloat16

    # Grouped block-diagonal fc weight: largest divisor G of K with
    # G*C_in <= group_lane_target (~one v6e/v7x MXU tile width).
    G = 1
    for g in range(1, K + 1):
        if K % g == 0 and g * C_in <= max(group_lane_target, C_in):
            G = g
    wfc_g = jnp.kron(jnp.eye(G, dtype=jnp.float32),
                     w_fc.T.astype(jnp.float32))            # (GC, GC)

    # Fold eval-mode BatchNorm into the mlp weight (scale) + one bias (shift).
    inv_std = 1.0 / jnp.sqrt(run_var.astype(jnp.float32) + eps)
    scale = gamma.astype(jnp.float32) * inv_std
    shift = beta.astype(jnp.float32) - run_mean.astype(jnp.float32) * scale
    wmlp_bn = jnp.tile(w_mlp.T.astype(jnp.float32), (K, 1)) * scale[None, :]

    return (wfc_g.astype(matmul_dtype),
            wmlp_bn.astype(matmul_dtype),
            shift.reshape(1, C_out).astype(jnp.float32))


@functools.partial(jax.jit, static_argnames=("tm",))
def att_pooling_cl(x_cl, wfc_g, wmlp_bn, shift, tm=None):
    """Channel-last fast path: x_cl (B, N, K, C_in) -> (B, N, C_out).

    No layout transposes — SWCFNet should keep activations channel-last
    between layers so the lane-dense rows stream straight from HBM.
    """
    B, N, K, C_in = x_cl.shape
    L = K * C_in
    GC = wfc_g.shape[0]
    C_out = wmlp_bn.shape[1]
    M = B * N

    x2 = x_cl.reshape(M, L)                          # contiguous, free reshape
    if tm is None:
        w_bytes = (wfc_g.size * wfc_g.dtype.itemsize
                   + wmlp_bn.size * wmlp_bn.dtype.itemsize
                   + shift.size * shift.dtype.itemsize)
        tm = _choose_tm(M, L, C_out, x_cl.dtype.itemsize,
                        x_cl.dtype.itemsize, w_bytes)
    num_tiles = -(-M // tm)                          # cdiv
    M_pad = num_tiles * tm
    if M_pad != M:
        # Fallback only: _choose_tm prefers a divisor of M, so this extra HBM
        # copy of x is normally skipped.
        x2 = jnp.pad(x2, ((0, M_pad - M), (0, 0)))

    kernel = functools.partial(att_pooling_kernel, K=K, C_in=C_in)
    out = pl.pallas_call(
        kernel,
        out_shape=jax.ShapeDtypeStruct((M_pad, C_out), x_cl.dtype),
        grid_spec=pltpu.PrefetchScalarGridSpec(
            num_scalar_prefetch=0,
            grid=(num_tiles,),
            in_specs=[
                pl.BlockSpec((tm, L), lambda i: (i, 0)),
                # Constant-index weight blocks: single-buffered to save VMEM.
                pl.BlockSpec((GC, GC), lambda i: (0, 0),
                             pipeline_mode=pl.Buffered(1)),
                pl.BlockSpec((L, C_out), lambda i: (0, 0),
                             pipeline_mode=pl.Buffered(1)),
                pl.BlockSpec((1, C_out), lambda i: (0, 0),
                             pipeline_mode=pl.Buffered(1)),
            ],
            out_specs=pl.BlockSpec((tm, C_out), lambda i: (i, 0)),
        ),
        compiler_params=pltpu.CompilerParams(
            dimension_semantics=("parallel",),
            vmem_limit_bytes=32 * 1024 * 1024,   # fits v7x scoped default
        ),
    )(x2, wfc_g, wmlp_bn, shift)

    return out[:M].reshape(B, N, C_out)


@functools.partial(jax.jit, static_argnames=("tm",))
def att_pooling(feature_set, wfc_g, wmlp_bn, shift, tm=None):
    """PyTorch-layout adapter: (B, d_in, N, K) NCHW -> (B, d_out, N, 1)."""
    # TODO(synk): drop this adapter (and its two transposes) once SWCFNet keeps
    # activations channel-last between layers; in this HBM-bound layer the
    # standalone relayout is the single largest remaining wall-clock cost.
    x_cl = jnp.transpose(feature_set, (0, 2, 3, 1))          # (B, N, K, C_in)
    out = att_pooling_cl(x_cl, wfc_g, wmlp_bn, shift, tm=tm)  # (B, N, C_out)
    return jnp.transpose(out, (0, 2, 1))[..., None]


def att_pooling_ref(feature_set, w_fc, w_mlp, gamma, beta, run_mean, run_var,
                    eps=1e-5):
    """Pure-JAX reference mirroring the PyTorch forward (NCHW, eval-mode BN)."""
    att = jnp.einsum("bcnk,dc->bdnk", feature_set, w_fc)
    att = jax.nn.softmax(att, axis=3)
    agg = jnp.sum(feature_set * att, axis=3, keepdims=True)      # (B, C_in, N, 1)
    out = jnp.einsum("bcnk,dc->bdnk", agg, w_mlp)                 # (B, C_out, N, 1)
    scale = (gamma / jnp.sqrt(run_var + eps)).reshape(1, -1, 1, 1)
    shift = (beta - run_mean * gamma / jnp.sqrt(run_var + eps)).reshape(1, -1, 1, 1)
    return jnp.maximum(out * scale + shift, 0.0)


if __name__ == "__main__":
    B, d_in, d_out, N, K = 2, 16, 32, 64, 8   # feature_set: (B, d_in, N, K)

    key = jax.random.PRNGKey(0)
    ks = jax.random.split(key, 6)
    feature_set = jax.random.normal(ks[0], (B, d_in, N, K), dtype=jnp.float32)

    # Deterministic parameter init (synthetic; conv weights squeezed from 1x1).
    w_fc = jax.random.normal(ks[1], (d_in, d_in), dtype=jnp.float32) * 0.1
    w_mlp = jax.random.normal(ks[2], (d_out, d_in), dtype=jnp.float32) * 0.1
    gamma = jax.random.uniform(ks[3], (d_out,), dtype=jnp.float32,
                               minval=0.5, maxval=1.5)
    beta = jax.random.normal(ks[4], (d_out,), dtype=jnp.float32) * 0.1
    run_mean = jax.random.normal(ks[5], (d_out,), dtype=jnp.float32) * 0.1
    run_var = jnp.ones((d_out,), dtype=jnp.float32)

    # Weight preprocessing hoisted out of the forward pass (once per layer).
    params = prepare_att_pooling_params(w_fc, w_mlp, gamma, beta,
                                        run_mean, run_var, K)

    out = att_pooling(feature_set, *params)
    out = jax.block_until_ready(out)

    ref = att_pooling_ref(feature_set, w_fc, w_mlp, gamma, beta,
                          run_mean, run_var)
    assert out.shape == (B, d_out, N, 1), out.shape
    assert jnp.allclose(out, ref, atol=1e-4, rtol=1e-4), \
        float(jnp.max(jnp.abs(out - ref)))

    print("KERNEL_OK")
</pallas_src>

<mosaic_0001>
module attributes {stable_mosaic.version = 11 : i64} {
  func.func @att_pooling_kernel(%arg0: i32, %arg1: memref<32x128xf32, #tpu.memory_space<vmem>>, %arg2: memref<128x128xf32, #tpu.memory_space<vmem>>, %arg3: memref<128x32xf32, #tpu.memory_space<vmem>>, %arg4: memref<1x32xf32, #tpu.memory_space<vmem>>, %arg5: memref<32x32xf32, #tpu.memory_space<vmem>>) attributes {dimension_semantics = [#tpu.dimension_semantics<parallel>], iteration_bounds = array<i64: 4>, scalar_prefetch = 0 : i64, scratch_operands = 0 : i64, tpu.core_type = #tpu.core_type<tc>, window_params = [{transform_indices = @transform_0, window_bounds = array<i64: 32, 128>}, {pipeline_mode = #tpu.pipeline_mode<synchronous>, transform_indices = @transform_1, window_bounds = array<i64: 128, 128>}, {pipeline_mode = #tpu.pipeline_mode<synchronous>, transform_indices = @transform_2, window_bounds = array<i64: 128, 32>}, {pipeline_mode = #tpu.pipeline_mode<synchronous>, transform_indices = @transform_3, window_bounds = array<i64: 1, 32>}, {transform_indices = @transform_4, window_bounds = array<i64: 32, 32>}]} {
    %c0 = arith.constant 0 : index
    %c0_0 = arith.constant 0 : index
    %0 = vector.load %arg1[%c0, %c0_0] : memref<32x128xf32, #tpu.memory_space<vmem>>, vector<32x128xf32>
    %c0_1 = arith.constant 0 : index
    %c0_2 = arith.constant 0 : index
    %1 = vector.load %arg2[%c0_1, %c0_2] : memref<128x128xf32, #tpu.memory_space<vmem>>, vector<128x128xf32>
    %cst = arith.constant dense<0.000000e+00> : vector<32x128xf32>
    %2 = tpu.matmul %0, %1, %cst {dimension_numbers = #tpu.dot_dimension_numbers<[1], [0], [0], [1], [0, 0, 1, 1], [], []>} : vector<32x128xf32>, vector<128x128xf32>, vector<32x128xf32> -> vector<32x128xf32>
    %c16_i32 = arith.constant 16 : i32
    %3 = tpu.dynamic_rotate %2 by %c16_i32 dim 1 : vector<32x128xf32>, i32 -> vector<32x128xf32>
    %4 = arith.maximumf %2, %3 : vector<32x128xf32>
    %c32_i32 = arith.constant 32 : i32
    %5 = tpu.dynamic_rotate %4 by %c32_i32 dim 1 : vector<32x128xf32>, i32 -> vector<32x128xf32>
    %6 = arith.maximumf %4, %5 : vector<32x128xf32>
    %c64_i32 = arith.constant 64 : i32
    %7 = tpu.dynamic_rotate %6 by %c64_i32 dim 1 : vector<32x128xf32>, i32 -> vector<32x128xf32>
    %8 = arith.maximumf %6, %7 : vector<32x128xf32>
    %9 = arith.subf %2, %8 : vector<32x128xf32>
    %10 = math.exp %9 : vector<32x128xf32>
    %c16_i32_3 = arith.constant 16 : i32
    %11 = tpu.dynamic_rotate %10 by %c16_i32_3 dim 1 : vector<32x128xf32>, i32 -> vector<32x128xf32>
    %12 = arith.addf %10, %11 : vector<32x128xf32>
    %c32_i32_4 = arith.constant 32 : i32
    %13 = tpu.dynamic_rotate %12 by %c32_i32_4 dim 1 : vector<32x128xf32>, i32 -> vector<32x128xf32>
    %14 = arith.addf %12, %13 : vector<32x128xf32>
    %c64_i32_5 = arith.constant 64 : i32
    %15 = tpu.dynamic_rotate %14 by %c64_i32_5 dim 1 : vector<32x128xf32>, i32 -> vector<32x128xf32>
    %16 = arith.addf %14, %15 : vector<32x128xf32>
    %17 = tpu.reciprocal %16 {approx = true} : vector<32x128xf32> -> vector<32x128xf32>
    %18 = arith.mulf %16, %17 : vector<32x128xf32>
    %cst_6 = arith.constant 2.000000e+00 : f32
    %19 = vector.broadcast %cst_6 : f32 to vector<32x128xf32>
    %20 = arith.subf %19, %18 : vector<32x128xf32>
    %21 = arith.mulf %17, %20 : vector<32x128xf32>
    %22 = arith.mulf %10, %21 : vector<32x128xf32>
    %23 = arith.mulf %0, %22 : vector<32x128xf32>
    %c0_7 = arith.constant 0 : index
    %c0_8 = arith.constant 0 : index
    %24 = vector.load %arg3[%c0_7, %c0_8] : memref<128x32xf32, #tpu.memory_space<vmem>>, vector<128x32xf32>
    %cst_9 = arith.constant dense<0.000000e+00> : vector<32x32xf32>
    %25 = tpu.matmul %23, %24, %cst_9 {dimension_numbers = #tpu.dot_dimension_numbers<[1], [0], [0], [1], [0, 0, 1, 1], [], []>} : vector<32x128xf32>, vector<128x32xf32>, vector<32x32xf32> -> vector<32x32xf32>
    %c0_10 = arith.constant 0 : index
    %c0_11 = arith.constant 0 : index
    %26 = vector.load %arg4[%c0_10, %c0_11] : memref<1x32xf32, #tpu.memory_space<vmem>>, vector<1x32xf32>
    %27 = vector.broadcast %26 : vector<1x32xf32> to vector<32x32xf32>
    %28 = arith.addf %25, %27 : vector<32x32xf32>
    %cst_12 = arith.constant 0.000000e+00 : f32
    %29 = vector.broadcast %cst_12 : f32 to vector<32x32xf32>
    %30 = arith.maximumf %28, %29 : vector<32x32xf32>
    %c0_13 = arith.constant 0 : index
    %c0_14 = arith.constant 0 : index
    %31 = vector.load %arg5[%c0_13, %c0_14] : memref<32x32xf32, #tpu.memory_space<vmem>>, vector<32x32xf32>
    tpu.vector_store %arg5[%c0_13, %c0_14], %30 {strides = array<i32>} : memref<32x32xf32, #tpu.memory_space<vmem>>, vector<32x32xf32>,
    return
  }
  func.func @transform_0(%arg0: i32) -> (i32, i32) {
    %c0_i32 = arith.constant 0 : i32
    %c0_i32_0 = arith.constant 0 : i32
    return %arg0, %c0_i32 : i32, i32
  }
  func.func @transform_1(%arg0: i32) -> (i32, i32) {
    %c0_i32 = arith.constant 0 : i32
    %c0_i32_0 = arith.constant 0 : i32
    %c0_i32_1 = arith.constant 0 : i32
    return %c0_i32, %c0_i32_0 : i32, i32
  }
  func.func @transform_2(%arg0: i32) -> (i32, i32) {
    %c0_i32 = arith.constant 0 : i32
    %c0_i32_0 = arith.constant 0 : i32
    %c0_i32_1 = arith.constant 0 : i32
    return %c0_i32, %c0_i32_0 : i32, i32
  }
  func.func @transform_3(%arg0: i32) -> (i32, i32) {
    %c0_i32 = arith.constant 0 : i32
    %c0_i32_0 = arith.constant 0 : i32
    %c0_i32_1 = arith.constant 0 : i32
    return %c0_i32, %c0_i32_0 : i32, i32
  }
  func.func @transform_4(%arg0: i32) -> (i32, i32) {
    %c0_i32 = arith.constant 0 : i32
    %c0_i32_0 = arith.constant 0 : i32
    return %arg0, %c0_i32 : i32, i32
  }
}

</mosaic_0001>

<bundles_post_ra>
// kernel: att_pooling_cl.1
= control target key start
LH: loop header
LB: loop body
LE: loop exit
PB: predicated region body
PF: predicated region fallthrough
CT: control target
= control target key end

     0   :  { %s842_s15 = smov 0   ;;  %s1031_s0 = inlined_call_operand.vmem [shape: f32[128,128], index: 0, kind: input, shape index: {}]   ;;  %s1032_s1 = inlined_call_operand.vmem [shape: f32[128,128], index: 1, kind: input, shape index: {}]   ;;  %s1033_s2 = inlined_call_operand.vmem [shape: f32[128,32], index: 2, kind: input, shape index: {}]   ;;  %s1034_s3 = inlined_call_operand.vmem [shape: f32[1,32], index: 3, kind: input, shape index: {}]   ;;  %s1035_s4 = inlined_call_operand.vmem [shape: f32[128,32], index: 4, kind: output, shape index: {}]  }
   0x1 LB: > { %s587_s16 = sadd.s32 4294967295, %s812_s15   ;;  %p591_p0 = scmp.ge.s32.totalorder %s812_s15, 1  ;;  %s812_s15 = sphi %s842_s15, %s14_s15  }
   0x2   : > { %p163_p1 = scmp.lt.s32.totalorder %s812_s15, 5 }
   0x4   : > { %p164_p2 = pnand %p591_p0, %p163_p1 }
   0x5   : > { %v205_v0 = vld [vmem:[%s1032_s1] sm:$0xff] (!%p164_p2)  ;;  %v206_v1 = vld [vmem:[%s1032_s1 + $0x8] sm:$0xff] (!%p164_p2)  ;;  %v207_v2 = vld [vmem:[%s1032_s1 + $0x10] sm:$0xff] (!%p164_p2)  ;;  %s592_s23 = sshll.u32 (!%p164_p2), %s587_s16, 2  ;;  %s814_s5 = smov (!%p164_p2), 16   ;;  %vm526_vm0 = vcmask (!%p164_p2), 261120  }
   0x6   : > { %167 = sbr.rel (%p164_p2) target bundleno = 1218 (0x4c2), region = 36  ;;  %v715_v3 = vpack.c.bf16 (!%p164_p2), %v206_v1, %v205_v0  ;;  %v208_v4 = vld [vmem:[%s1032_s1 + $0x18] sm:$0xff] (!%p164_p2)  ;;  %p190_p3 = scmp.lt.s32.totalorder (!%p164_p2), %s592_s23, 15  ;;  %v209_v6 = vld [vmem:[%s1032_s1 + $0x20] sm:$0xff] (!%p164_p2)  ;;  %v210_v7 = vld [vmem:[%s1032_s1 + $0x28] sm:$0xff] (!%p164_p2) }
   0x7   : > { %v719_v5 = vpack.c.bf16 (!%p164_p2), %v208_v4, %v207_v2  ;;  %v723_v8 = vpack.c.bf16 (!%p164_p2), %v210_v7, %v209_v6  ;;  %v211_v9 = vld [vmem:[%s1032_s1 + $0x30] sm:$0xff] (!%p164_p2)  ;;  %v212_v10 = vld [vmem:[%s1032_s1 + $0x38] sm:$0xff] (!%p164_p2)  ;;  %v213_v13 = vld [vmem:[%s1032_s1 + $0x40] sm:$0xff] (!%p164_p2)  ;;  %s815_s6 = smov (!%p164_p2), 32   ;;  %s816_s7 = smov (!%p164_p2), 64  }
   0x8   : > { %716 = vmatprep.subr.bf16.mxu0 (!%p164_p2), %v715_v3  ;;  %v727_v12 = vpack.c.bf16 (!%p164_p2), %v212_v10, %v211_v9  ;;  %v214_v14 = vld [vmem:[%s1032_s1 + $0x48] sm:$0xff] (!%p164_p2)  ;;  %v215_v16 = vld [vmem:[%s1032_s1 + $0x50] sm:$0xff] (!%p164_p2)  ;;  %v216_v17 = vld [vmem:[%s1032_s1 + $0x58] sm:$0xff] (!%p164_p2) }
   0x9   : > { %718 = vmatpush3.bf16.msra.mxu0 (!%p164_p2), %v715_v3  ;;  %v731_v15 = vpack.c.bf16 (!%p164_p2), %v214_v14, %v213_v13  ;;  %v735_v18 = vpack.c.bf16 (!%p164_p2), %v216_v17, %v215_v16  ;;  %v217_v19 = vld [vmem:[%s1032_s1 + $0x60] sm:$0xff] (!%p164_p2)  ;;  %v218_v20 = vld [vmem:[%s1032_s1 + $0x68] sm:$0xff] (!%p164_p2)  ;;  %v219_v22 = vld [vmem:[%s1032_s1 + $0x70] sm:$0xff] (!%p164_p2) }
   0xa   : > { %720 = vmatprep.subr.bf16.mxu0 (!%p164_p2), %v719_v5  ;;  %v739_v21 = vpack.c.bf16 (!%p164_p2), %v218_v20, %v217_v19  ;;  %v220_v23 = vld [vmem:[%s1032_s1 + $0x78] sm:$0xff] (!%p164_p2)  ;;  %v414_v6 = vld [vmem:[%s1033_s2] sm:$0xff] (!%p164_p2)  ;;  %v415_v7 = vld [vmem:[%s1033_s2 + $0x8] sm:$0xff] (!%p164_p2) }
   0xb   : > { %v743_v24 = vpack.c.bf16 (!%p164_p2), %v220_v23, %v219_v22  ;;  %v747_v9 = vpack.c.bf16 (!%p164_p2), %v415_v7, %v414_v6  ;;  %v417_v10 = vld [vmem:[%s1033_s2 + $0x18] sm:$0xff] (!%p164_p2)  ;;  %v418_v19 = vld [vmem:[%s1033_s2 + $0x20] sm:$0xff] (!%p164_p2)  ;;  %v419_v20 = vld [vmem:[%s1033_s2 + $0x28] sm:$0xff] (!%p164_p2) }
   0xc   : > { %v420_v22 = vld [vmem:[%s1033_s2 + $0x30] sm:$0xff] (!%p164_p2)  ;;  %v421_v23 = vld [vmem:[%s1033_s2 + $0x38] sm:$0xff] (!%p164_p2) }
   0xd   : > { %s1037_s23 = smov (!%p190_p3, %s592_s23), 15  ;;  %722 = vmatpush3.bf16.msra.mxu0 %v719_v5  ;;  %748 = vmatprep.subr.bf16.mxu1 %v747_v9 }
   0xe   : > { %s593_s30 = sshll.u32 %s1037_s23, 3  ;;  %724 = vmatprep.subr.bf16.mxu0 %v723_v8  ;;  %750 = vmatpush3.bf16.msra.mxu1 %v747_v9 }
   0xf   : > { %s882_s11 = scalar_lea.vmem %s1031_s0, %s593_s30  ;;  %s199_s22 = scalar_lea.vmem %s1035_s4, %s593_s30 }
  0x10   : > { %v885_v11 = vld [vmem:[%s882_s11] sm:$0xff]  ;;  %v913_v25 = vld [vmem:[%s882_s11 + $0x8] sm:$0xff]  ;;  %v916_v26 = vld [vmem:[%s882_s11 + $0x10] sm:$0xff] }
  0x11   : > { %671 = vmatprep.mubr.f32.mxu0 %v885_v11  ;;  %726 = vmatpush3.bf16.msra.mxu0 %v723_v8  ;;  %v921_v27 = vld [vmem:[%s882_s11 + $0x18] sm:$0xff]  ;;  %v416_v8 = vld [vmem:[%s1033_s2 + $0x10] sm:$0xff] }
  0x12   : > { %728 = vmatprep.subr.bf16.mxu0 %v727_v12 }
  0x15   : > { %730 = vmatpush3.bf16.msra.mxu0 %v727_v12  ;;  %v751_v12 = vpack.c.bf16 %v417_v10, %v416_v8 }
  0x16   : > { %732 = vmatprep.subr.bf16.mxu0 %v731_v15 }
  0x17   : > { %752 = vmatprep.subr.bf16.mxu1 %v751_v12 }
  0x18   : > { %754 = vmatpush3.bf16.msra.mxu1 %v751_v12 }
  0x19   : > { %734 = vmatpush3.bf16.msra.mxu0 %v731_v15 }
  0x1a   : > { %736 = vmatprep.subr.bf16.mxu0 %v735_v18 }
  0x1d   : > { %738 = vmatpush3.bf16.msra.mxu0 %v735_v18 }
  0x1e   : > { %740 = vmatprep.subr.bf16.mxu0 %v739_v21 }
  0x21   : > { %742 = vmatpush3.bf16.msra.mxu0 %v739_v21  ;;  %v755_v21 = vpack.c.bf16 %v419_v20, %v418_v19  ;;  %v596_v19 = vld [vmem:[%s1034_s3] ss:$0 sm:$0xff] }
  0x22   : > { %744 = vmatprep.subr.bf16.mxu0 %v743_v24 }
  0x23   : > { %756 = vmatprep.subr.bf16.mxu1 %v755_v21 }
  0x24   : > { %758 = vmatpush3.bf16.msra.mxu1 %v755_v21 }
  0x25   : > { %746 = vmatpush3.bf16.msra.mxu0 %v743_v24  ;;  %v759_v24 = vpack.c.bf16 %v421_v23, %v420_v22 }
  0x27   : > { %760 = vmatprep.subr.bf16.mxu1 %v759_v24 }
  0x28   : > { %672 = vmatmul.mubr.f32.vlgmr.msra.gmra.mrb[0].mxu0 %v913_v25  ;;  %762 = vmatpush3.bf16.msra.mxu1 %v759_v24 }
  0x29   : > { %674 = vmatprep.mubr.f32.mxu0 %v916_v26 }
  0x2c   : > { %675 = vmatmul.mubr.f32.gmra.mrb[2].mxu0 %v921_v27 }
  0xfb   : > { %v673_v28 = vpop.f32.mrb[0].mxu0 }
  0xfc   : > { %v287_v29 = vpop.f32.mrb[1].mxu0 }
  0xfd   : > { %306 = vrot.lane.b32.xlu0 %v287_v29, %s814_s5 }
  0xff   : > { %v676_v30 = vpop.f32.mrb[2].mxu0 }
 0x100   : > { %v297_v31 = vpop.f32.mrb[3].mxu0 }
 0x101   : > { %308 = vrot.lane.b32.xlu0 %v673_v28, %s814_s5  ;;  %310 = vrot.lane.b32.xlu1 %v297_v31, %s814_s5 }
 0x105   : > { %312 = vrot.lane.b32.xlu1 %v676_v30, %s814_s5 }
 0x16f   : > { %v307_v32 = vpop.permute.xlu0 %306 }
 0x170   : > { %v314_v33 = vmax.f32 %v287_v29, %v307_v32 }
 0x172   : > { %318 = vrot.lane.b32.xlu0 %v314_v33, %s815_s6 }
 0x173   : > { %v309_v34 = vpop.permute.xlu0 %308  ;;  %v311_v35 = vpop.permute.xlu1 %310 }
 0x174   : > { %v315_v36 = vmax.f32 %v673_v28, %v309_v34  ;;  %v316_v37 = vmax.f32 %v297_v31, %v311_v35  ;;  %v425_v34 = vld [vmem:[%s1033_s2 + $0x58] sm:$0xff] }
 0x176   : > { %320 = vrot.lane.b32.xlu1 %v315_v36, %s815_s6  ;;  %322 = vrot.lane.b32.xlu0 %v316_v37, %s815_s6 }
 0x177   : > { %v313_v38 = vpop.permute.xlu1 %312 }
 0x178   : > { %v317_v39 = vmax.f32 %v676_v30, %v313_v38 }
 0x17a   : > { %324 = vrot.lane.b32.xlu1 %v317_v39, %s815_s6 }
 0x1e4   : > { %v319_v40 = vpop.permute.xlu0 %318 }
 0x1e5   : > { %v326_v41 = vmax.f32 %v314_v33, %v319_v40  ;;  %v424_v33 = vld [vmem:[%s1033_s2 + $0x50] sm:$0xff]  ;;  %v426_v40 = vld [vmem:[%s1033_s2 + $0x60] sm:$0xff] }
 0x1e7   : > { %330 = vrot.lane.b32.xlu0 %v326_v41, %s816_s7 }
 0x1e8   : > { %v323_v42 = vpop.permute.xlu0 %322  ;;  %v321_v43 = vpop.permute.xlu1 %320 }
 0x1e9   : > { %v328_v44 = vmax.f32 %v316_v37, %v323_v42  ;;  %v327_v45 = vmax.f32 %v315_v36, %v321_v43  ;;  %v767_v36 = vpack.c.bf16 %v425_v34, %v424_v33 }
 0x1eb   : > { %334 = vrot.lane.b32.xlu0 %v328_v44, %s816_s7  ;;  %332 = vrot.lane.b32.xlu1 %v327_v45, %s816_s7 }
 0x1ec   : > { %v325_v46 = vpop.permute.xlu1 %324 }
 0x1ed   : > { %v329_v47 = vmax.f32 %v317_v39, %v325_v46  ;;  %v429_v46 = vld [vmem:[%s1033_s2 + $0x78] sm:$0xff] }
 0x1ef   : > { %336 = vrot.lane.b32.xlu1 %v329_v47, %s816_s7 }
 0x259   : > { %v331_v48 = vpop.permute.xlu0 %330 }
 0x25a   : > { %v338_v49 = vmax.f32 %v326_v41, %v331_v48  ;;  %v427_v41 = vld [vmem:[%s1033_s2 + $0x68] sm:$0xff] }
 0x25b   : > { %v771_v42 = vpack.c.bf16 %v427_v41, %v426_v40 }
 0x25c   : > { %v342_v50 = vsub.f32 %v287_v29, %v338_v49  ;;  %v423_v29 = vld [vmem:[%s1033_s2 + $0x48] sm:$0xff] }
 0x25d   : > { %v335_v51 = vpop.permute.xlu0 %334  ;;  %v333_v52 = vpop.permute.xlu1 %332 }
 0x25e   : > { %v346_v53 = vmul.f32 1.442695, %v342_v50  ;;  %v340_v54 = vmax.f32 %v328_v44, %v335_v51  ;;  %v339_v55 = vmax.f32 %v327_v45, %v333_v52  ;;  %v428_v45 = vld [vmem:[%s1033_s2 + $0x70] sm:$0xff] }
 0x260   : > { %790 = vpow2.f32 %v346_v53  ;;  %v344_v56 = vsub.f32 %v297_v31, %v340_v54  ;;  %v343_v57 = vsub.f32 %v673_v28, %v339_v55  ;;  %v422_v28 = vld [vmem:[%s1033_s2 + $0x40] sm:$0xff] }
 0x261   : > { %v337_v58 = vpop.permute.xlu1 %336  ;;  %v763_v31 = vpack.c.bf16 %v423_v29, %v422_v28 }
 0x262   : > { %v350_v59 = vmul.f32 1.442695, %v344_v56  ;;  %v348_v60 = vmul.f32 1.442695, %v343_v57  ;;  %v341_v61 = vmax.f32 %v329_v47, %v337_v58  ;;  %v775_v47 = vpack.c.bf16 %v429_v46, %v428_v45 }
 0x263   : > { %764 = vmatprep.subr.bf16.mxu1 %v763_v31 }
 0x264   : > { %792 = vpow2.f32 %v350_v59  ;;  %v345_v62 = vsub.f32 %v676_v30, %v341_v61  ;;  %766 = vmatpush3.bf16.msra.mxu1 %v763_v31 }
 0x265   : > { %794 = vpow2.f32 %v348_v60  ;;  %768 = vmatprep.subr.bf16.mxu1 %v767_v36 }
 0x266   : > { %v352_v63 = vmul.f32 1.442695, %v345_v62 }
 0x268   : > { %796 = vpow2.f32 %v352_v63  ;;  %770 = vmatpush3.bf16.msra.mxu1 %v767_v36 }
 0x269   : > { %772 = vmatprep.subr.bf16.mxu1 %v771_v42 }
 0x26a   : > { %v936_v0 = vpop.eup %790 }
 0x26b   : > { %354 = vrot.lane.b32.xlu0 %v936_v0, %s814_s5 }
 0x26c   : > { %774 = vmatpush3.bf16.msra.mxu1 %v771_v42 }
 0x26d   : > { %776 = vmatprep.subr.bf16.mxu1 %v775_v47 }
 0x26e   : > { %v940_v1 = vpop.eup %792 }
 0x26f   : > { %v942_v2 = vpop.eup %794  ;;  %358 = vrot.lane.b32.xlu0 %v940_v1, %s814_s5 }
 0x270   : > { %356 = vrot.lane.b32.xlu1 %v942_v2, %s814_s5  ;;  %778 = vmatpush3.bf16.msra.mxu1 %v775_v47 }
 0x272   : > { %v948_v3 = vpop.eup %796 }
 0x274   : > { %360 = vrot.lane.b32.xlu1 %v948_v3, %s814_s5 }
 0x2dd   : > { %v355_v4 = vpop.permute.xlu0 %354 }
 0x2de   : > { %v362_v5 = vadd.f32 %v936_v0, %v355_v4 }
 0x2e0   : > { %366 = vrot.lane.b32.xlu0 %v362_v5, %s815_s6 }
 0x2e1   : > { %v359_v13 = vpop.permute.xlu0 %358 }
 0x2e2   : > { %v364_v14 = vadd.f32 %v940_v1, %v359_v13  ;;  %v357_v15 = vpop.permute.xlu1 %356 }
 0x2e3   : > { %v363_v16 = vadd.f32 %v942_v2, %v357_v15 }
 0x2e4   : > { %370 = vrot.lane.b32.xlu0 %v364_v14, %s815_s6 }
 0x2e5   : > { %368 = vrot.lane.b32.xlu1 %v363_v16, %s815_s6 }
 0x2e6   : > { %v361_v17 = vpop.permute.xlu1 %360 }
 0x2e7   : > { %v365_v18 = vadd.f32 %v948_v3, %v361_v17 }
 0x2e9   : > { %372 = vrot.lane.b32.xlu1 %v365_v18, %s815_s6 }
 0x352   : > { %v367_v30 = vpop.permute.xlu0 %366 }
 0x353   : > { %v374_v32 = vadd.f32 %v367_v30, %v362_v5 }
 0x355   : > { %378 = vrot.lane.b32.xlu0 %v374_v32, %s816_s7 }
 0x356   : > { %v371_v35 = vpop.permute.xlu0 %370 }
 0x357   : > { %v376_v37 = vadd.f32 %v371_v35, %v364_v14  ;;  %v369_v38 = vpop.permute.xlu1 %368 }
 0x358   : > { %v375_v39 = vadd.f32 %v369_v38, %v363_v16 }
 0x359   : > { %382 = vrot.lane.b32.xlu0 %v376_v37, %s816_s7 }
 0x35a   : > { %380 = vrot.lane.b32.xlu1 %v375_v39, %s816_s7 }
 0x35b   : > { %v373_v43 = vpop.permute.xlu1 %372 }
 0x35c   : > { %v377_v44 = vadd.f32 %v373_v43, %v365_v18 }
 0x35e   : > { %384 = vrot.lane.b32.xlu1 %v377_v44, %s816_s7 }
 0x3c7   : > { %v379_v48 = vpop.permute.xlu0 %378 }
 0x3c8   : > { %v386_v49 = vadd.f32 %v379_v48, %v374_v32 }
 0x3ca   : > { %798 = vrcp.f32 %v386_v49 }
 0x3cb   : > { %v383_v50 = vpop.permute.xlu0 %382 }
 0x3cc   : > { %v388_v51 = vadd.f32 %v383_v50, %v376_v37  ;;  %v381_v52 = vpop.permute.xlu1 %380 }
 0x3cd   : > { %v387_v53 = vadd.f32 %v381_v52, %v375_v39 }
 0x3ce   : > { %800 = vrcp.f32 %v388_v51 }
 0x3cf   : > { %802 = vrcp.f32 %v387_v53 }
 0x3d0   : > { %v385_v54 = vpop.permute.xlu1 %384 }
 0x3d1   : > { %v389_v55 = vadd.f32 %v385_v54, %v377_v44 }
 0x3d3   : > { %804 = vrcp.f32 %v389_v55 }
 0x3d4   : > { %v799_v56 = vpop.eup %798 }
 0x3d5   : > { %v394_v57 = vmul.f32 %v799_v56, %v386_v49 }
 0x3d7   : > { %v398_v58 = vsub.f32 2.0, %v394_v57 }
 0x3d8   : > { %v801_v59 = vpop.eup %800 }
 0x3d9   : > { %v803_v60 = vpop.eup %802  ;;  %v396_v61 = vmul.f32 %v801_v59, %v388_v51  ;;  %v402_v62 = vmul.f32 %v799_v56, %v398_v58 }
 0x3da   : > { %v395_v63 = vmul.f32 %v803_v60, %v387_v53 }
 0x3db   : > { %v400_v4 = vsub.f32 2.0, %v396_v61  ;;  %v406_v5 = vmul.f32 %v936_v0, %v402_v62 }
 0x3dc   : > { %v399_v6 = vsub.f32 2.0, %v395_v63 }
 0x3dd   : > { %v805_v7 = vpop.eup %804  ;;  %v404_v8 = vmul.f32 %v801_v59, %v400_v4  ;;  %v410_v9 = vmul.f32 %v406_v5, %v885_v11 }
 0x3de   : > { %v403_v10 = vmul.f32 %v803_v60, %v399_v6  ;;  %v397_v12 = vmul.f32 %v805_v7, %v389_v55 }
 0x3df   : > { %709 = vmatprep.mubr.f32.mxu1 %v410_v9  ;;  %v408_v13 = vmul.f32 %v940_v1, %v404_v8 }
 0x3e0   : > { %v401_v14 = vsub.f32 2.0, %v397_v12  ;;  %v407_v15 = vmul.f32 %v942_v2, %v403_v10 }
 0x3e1   : > { %v412_v16 = vmul.f32 %v408_v13, %v916_v26 }
 0x3e2   : > { %v405_v17 = vmul.f32 %v805_v7, %v401_v14  ;;  %v411_v18 = vmul.f32 %v407_v15, %v913_v25 }
 0x3e4   : > { %710 = vmatmul.mubr.f32.vlgmr.msra.gmra.mrb[0].mxu1 %v411_v18  ;;  %v409_v0 = vmul.f32 %v948_v3, %v405_v17 }
 0x3e5   : > { %712 = vmatprep.mubr.f32.mxu1 %v412_v16 }
 0x3e6   : > { %v413_v11 = vmul.f32 %v409_v0, %v921_v27 }
 0x3e8   : > { %713 = vmatmul.mubr.f32.gmra.mrb[2].mxu1 %v413_v11 }
 0x4b7   : > { %v711_v1 = vpop.f32.mrb[0].mxu1 }
 0x4b8   : > { %v509_v20 = vadd.f32 %v711_v1, %v596_v19  ;;  %v503_v21 = vpop.f32.mrb[1].mxu1 }
 0x4b9   : > { %v504_v25 = vadd.f32 %v596_v19, %v503_v21 }
 0x4ba   : > { %v523_v26 = vmax.f32 %v509_v20, 0.0 }
 0x4bb   : > { %v522_v2 = vmax.f32 %v504_v25, 0.0  ;;  %v714_v3 = vpop.f32.mrb[2].mxu1 }
 0x4bc   : > { %528 = vst.msk [vmem:[%s199_s22 + $0x8] sm:$0xff] %vm526_vm0, %v523_v26  ;;  %v519_v27 = vadd.f32 %v714_v3, %v596_v19  ;;  %v513_v22 = vpop.f32.mrb[3].mxu1 }
 0x4bd   : > { %527 = vst.msk [vmem:[%s199_s22] sm:$0xff] %vm526_vm0, %v522_v2  ;;  %v514_v23 = vadd.f32 %v596_v19, %v513_v22 }
 0x4be   : > { %v525_v24 = vmax.f32 %v519_v27, 0.0 }
 0x4bf   : > { %v524_v28 = vmax.f32 %v514_v23, 0.0 }
 0x4c0   : > { %530 = vst.msk [vmem:[%s199_s22 + $0x18] sm:$0xff] %vm526_vm0, %v525_v24 }
 0x4c1   : > { %529 = vst.msk [vmem:[%s199_s22 + $0x10] sm:$0xff] %vm526_vm0, %v524_v28 }
 0x4c2 PF: > { %s14_s15 = sadd.s32 1, %s812_s15  }
 0x4c3   : > { %p11_p4 = scmp.ge.s32.totalorder %s14_s15, 6  }
 0x4c5   :  { %13 = sbr.rel (!%p11_p4) target bundleno = 1 (0x1), region = 66 }

</bundles_post_ra>
